<compile_context>
chip_gen: v7x
topology: tpu7x:2x2x1
jax: 0.10.0
libtpu: 0.0.40
codegen_flags: <defaults>
</compile_context>

<pallas_src>
import functools

import jax
import jax.numpy as jnp
from jax.experimental import pallas as pl
from jax.experimental.pallas import tpu as pltpu


def _softplus(x):
    # == log(exp(x) + 1); guarded so large pre-activations return x instead of +inf.
    # (select runs in the free VALU slot; exp/log1p hit the EUP.)
    safe = jnp.minimum(x, 20.0)
    return jnp.where(x > 20.0, x, jnp.log1p(jnp.exp(safe)))


def mlp_kernel(x_ref, w1_ref, b1_ref, w2_ref, b2_ref, w3t_ref, b3_ref, o_ref,
               *, use_bf16_matmul):
    # x_ref:   (in_dim, Bt)        batch on the lane axis
    # w1_ref:  (hidden, in_dim)    PyTorch orientation
    # w2_ref:  (hidden, hidden)
    # w3t_ref: (hidden, out_dim)   = W3.T (so column slices align with h2's sublanes)
    # biases:  (dim, 1)
    x = x_ref[...].astype(jnp.float32)          # (in_dim, Bt)
    w1 = w1_ref[...].astype(jnp.float32)        # (hidden, in_dim)
    in_dim = x.shape[0]

    # ---- layer 1: contraction depth in_dim (=2) -> VPU broadcast-FMAs, no MXU ----
    h = w1[:, 0:1] * x[0:1, :] + b1_ref[...]    # (hidden,1)*(1,Bt) -> (hidden,Bt)
    for i in range(1, in_dim):                  # static unroll (in_dim is tiny)
        h = h + w1[:, i:i + 1] * x[i:i + 1, :]
    h = _softplus(h)

    # ---- layer 2: the only real matmul (hidden x hidden x Bt) -> MXU ----
    if use_bf16_matmul:
        # bf16-native MXU on v6e/v7x; f32 accumulate.  Keep False on v5e / when
        # PINN accuracy needs full f32 inputs.
        h = jnp.dot(w2_ref[...].astype(jnp.bfloat16), h.astype(jnp.bfloat16),
                    preferred_element_type=jnp.float32)
    else:
        h = jnp.dot(w2_ref[...], h, preferred_element_type=jnp.float32)
    h = _softplus(h + b2_ref[...])

    # ---- layer 3: output width out_dim (=2) -> VPU multiply + sublane reduce ----
    w3t = w3t_ref[...].astype(jnp.float32)      # (hidden, out_dim)
    out_dim = w3t.shape[1]
    for j in range(out_dim):                    # static unroll (out_dim is tiny)
        row = jnp.sum(h * w3t[:, j:j + 1], axis=0, keepdims=True)   # (1, Bt)
        o_ref[j:j + 1, :] = (row + b3_ref[j:j + 1, 0:1]).astype(o_ref.dtype)


def net_forward(x, params, *, batch_tile=512, use_bf16_matmul=False):
    """Forward pass for Net.  x: (B, in_dim) -> (B, out_dim).

    params are in PyTorch layout: (w1 (h,in), b1 (h,), w2 (h,h), b2 (h,),
    w3 (out,h), b3 (out,)).
    """
    w1, b1, w2, b2, w3, b3 = params
    B, in_dim = x.shape
    hidden = w1.shape[0]
    out_dim = w3.shape[0]
    assert batch_tile % 128 == 0, "batch_tile must be lane-aligned (multiple of 128)"

    # Pad the batch so the grid covers it (no tiny-tile fallback needed).
    n_tiles = pl.cdiv(B, batch_tile)
    Bp = n_tiles * batch_tile

    # Layout plumbing (cheap XLA ops): batch on lanes, column biases, w3 transposed.
    xt = jnp.zeros((in_dim, Bp), x.dtype).at[:, :B].set(x.T)
    b1c = b1.reshape(hidden, 1)
    b2c = b2.reshape(hidden, 1)
    b3c = b3.reshape(out_dim, 1)
    w3t = w3.T                                   # (hidden, out_dim)

    full = lambda i: (0, 0)                      # weights stay VMEM-resident
    kernel = functools.partial(mlp_kernel, use_bf16_matmul=use_bf16_matmul)

    out_t = pl.pallas_call(
        kernel,
        out_shape=jax.ShapeDtypeStruct((out_dim, Bp), x.dtype),
        grid=(n_tiles,),
        in_specs=[
            pl.BlockSpec((in_dim, batch_tile), lambda i: (0, i)),
            pl.BlockSpec((hidden, in_dim), full),
            pl.BlockSpec((hidden, 1), full),
            pl.BlockSpec((hidden, hidden), full),
            pl.BlockSpec((hidden, 1), full),
            pl.BlockSpec((hidden, out_dim), full),
            pl.BlockSpec((out_dim, 1), full),
        ],
        out_specs=pl.BlockSpec((out_dim, batch_tile), lambda i: (0, i)),
        compiler_params=pltpu.CompilerParams(
            dimension_semantics=("parallel",),   # shards tiles across v7x's 2 TCs
        ),
    )(xt, w1, b1c, w2, b2c, w3t, b3c)

    return out_t[:, :B].T                        # back to (B, out_dim)


def init_params(key, input_size, hidden_size, output_size, dtype=jnp.float32):
    """PyTorch nn.Linear-style init: U(-1/sqrt(fan_in), 1/sqrt(fan_in)), (out,in) weights."""
    ks = jax.random.split(key, 6)

    def linear(kw, kb, fan_in, fan_out):
        bound = 1.0 / float(fan_in) ** 0.5
        w = jax.random.uniform(kw, (fan_out, fan_in), dtype, -bound, bound)
        b = jax.random.uniform(kb, (fan_out,), dtype, -bound, bound)
        return w, b

    w1, b1 = linear(ks[0], ks[1], input_size, hidden_size)
    w2, b2 = linear(ks[2], ks[3], hidden_size, hidden_size)
    w3, b3 = linear(ks[4], ks[5], hidden_size, output_size)
    return (w1, b1, w2, b2, w3, b3)


if __name__ == "__main__":
    input_size, hidden_size, output_size = 2, 32, 2
    batch = 1024            # PINN-style collocation batch (small, but lane-fillable)
    batch_tile = 256        # grid = 4 -> even split across two TensorCores on v7x

    key = jax.random.PRNGKey(0)
    k_x, k_p = jax.random.split(key)
    x = jax.random.normal(k_x, (batch, input_size), dtype=jnp.float32)
    params = init_params(k_p, input_size, hidden_size, output_size)

    out = net_forward(x, params, batch_tile=batch_tile)
    out = jax.block_until_ready(out)

    # Pure-JAX reference of the original module's math (PyTorch layout).
    w1, b1, w2, b2, w3, b3 = params
    ref = jnp.log(jnp.exp(x @ w1.T + b1) + 1.0)
    ref = jnp.log(jnp.exp(ref @ w2.T + b2) + 1.0)
    ref = ref @ w3.T + b3

    assert out.shape == (batch, output_size)
    assert jnp.allclose(out, ref, atol=1e-5, rtol=1e-5), "mismatch vs reference"

    print("KERNEL_OK")
</pallas_src>

<mosaic_0001>
module attributes {stable_mosaic.version = 11 : i64} {
  func.func @mlp_kernel(%arg0: i32, %arg1: memref<2x256xf32, #tpu.memory_space<vmem>>, %arg2: memref<32x2xf32, #tpu.memory_space<vmem>>, %arg3: memref<32x1xf32, #tpu.memory_space<vmem>>, %arg4: memref<32x32xf32, #tpu.memory_space<vmem>>, %arg5: memref<32x1xf32, #tpu.memory_space<vmem>>, %arg6: memref<32x2xf32, #tpu.memory_space<vmem>>, %arg7: memref<2x1xf32, #tpu.memory_space<vmem>>, %arg8: memref<2x256xf32, #tpu.memory_space<vmem>>) attributes {dimension_semantics = [#tpu.dimension_semantics<parallel>], iteration_bounds = array<i64: 4>, scalar_prefetch = 0 : i64, scratch_operands = 0 : i64, tpu.core_type = #tpu.core_type<tc>, window_params = [{transform_indices = @transform_0, window_bounds = array<i64: 2, 256>}, {pipeline_mode = #tpu.pipeline_mode<synchronous>, transform_indices = @transform_1, window_bounds = array<i64: 32, 2>}, {pipeline_mode = #tpu.pipeline_mode<synchronous>, transform_indices = @transform_2, window_bounds = array<i64: 32, 1>}, {pipeline_mode = #tpu.pipeline_mode<synchronous>, transform_indices = @transform_3, window_bounds = array<i64: 32, 32>}, {pipeline_mode = #tpu.pipeline_mode<synchronous>, transform_indices = @transform_4, window_bounds = array<i64: 32, 1>}, {pipeline_mode = #tpu.pipeline_mode<synchronous>, transform_indices = @transform_5, window_bounds = array<i64: 32, 2>}, {pipeline_mode = #tpu.pipeline_mode<synchronous>, transform_indices = @transform_6, window_bounds = array<i64: 2, 1>}, {transform_indices = @transform_7, window_bounds = array<i64: 2, 256>}]} {
    %c0 = arith.constant 0 : index
    %c0_0 = arith.constant 0 : index
    %0 = vector.load %arg1[%c0, %c0_0] : memref<2x256xf32, #tpu.memory_space<vmem>>, vector<2x256xf32>
    %c0_1 = arith.constant 0 : index
    %c0_2 = arith.constant 0 : index
    %1 = vector.load %arg2[%c0_1, %c0_2] : memref<32x2xf32, #tpu.memory_space<vmem>>, vector<32x2xf32>
    %2 = vector.extract_strided_slice %1 {offsets = [0, 0], sizes = [32, 1], strides = [1, 1]} : vector<32x2xf32> to vector<32x1xf32>
    %3 = vector.extract_strided_slice %0 {offsets = [0, 0], sizes = [1, 256], strides = [1, 1]} : vector<2x256xf32> to vector<1x256xf32>
    %4 = vector.broadcast %2 : vector<32x1xf32> to vector<32x256xf32>
    %5 = vector.broadcast %3 : vector<1x256xf32> to vector<32x256xf32>
    %6 = arith.mulf %4, %5 : vector<32x256xf32>
    %c0_3 = arith.constant 0 : index
    %c0_4 = arith.constant 0 : index
    %7 = vector.load %arg3[%c0_3, %c0_4] : memref<32x1xf32, #tpu.memory_space<vmem>>, vector<32x1xf32>
    %8 = vector.broadcast %7 : vector<32x1xf32> to vector<32x256xf32>
    %9 = arith.addf %6, %8 : vector<32x256xf32>
    %10 = vector.extract_strided_slice %1 {offsets = [0, 1], sizes = [32, 1], strides = [1, 1]} : vector<32x2xf32> to vector<32x1xf32>
    %11 = vector.extract_strided_slice %0 {offsets = [1, 0], sizes = [1, 256], strides = [1, 1]} : vector<2x256xf32> to vector<1x256xf32>
    %12 = vector.broadcast %10 : vector<32x1xf32> to vector<32x256xf32>
    %13 = vector.broadcast %11 : vector<1x256xf32> to vector<32x256xf32>
    %14 = arith.mulf %12, %13 : vector<32x256xf32>
    %15 = arith.addf %9, %14 : vector<32x256xf32>
    %cst = arith.constant 2.000000e+01 : f32
    %16 = vector.broadcast %cst : f32 to vector<32x256xf32>
    %17 = arith.minimumf %15, %16 : vector<32x256xf32>
    %cst_5 = arith.constant 2.000000e+01 : f32
    %18 = vector.broadcast %cst_5 : f32 to vector<32x256xf32>
    %19 = arith.cmpf ogt, %15, %18 : vector<32x256xf32>
    %20 = math.exp %17 : vector<32x256xf32>
    %21 = math.log1p %20 : vector<32x256xf32>
    %22 = arith.select %19, %15, %21 : vector<32x256xi1>, vector<32x256xf32>
    %c0_6 = arith.constant 0 : index
    %c0_7 = arith.constant 0 : index
    %23 = vector.load %arg4[%c0_6, %c0_7] : memref<32x32xf32, #tpu.memory_space<vmem>>, vector<32x32xf32>
    %cst_8 = arith.constant dense<0.000000e+00> : vector<32x256xf32>
    %24 = tpu.matmul %23, %22, %cst_8 {dimension_numbers = #tpu.dot_dimension_numbers<[1], [0], [0], [1], [0, 0, 1, 1], [], []>} : vector<32x32xf32>, vector<32x256xf32>, vector<32x256xf32> -> vector<32x256xf32>
    %c0_9 = arith.constant 0 : index
    %c0_10 = arith.constant 0 : index
    %25 = vector.load %arg5[%c0_9, %c0_10] : memref<32x1xf32, #tpu.memory_space<vmem>>, vector<32x1xf32>
    %26 = vector.broadcast %25 : vector<32x1xf32> to vector<32x256xf32>
    %27 = arith.addf %24, %26 : vector<32x256xf32>
    %cst_11 = arith.constant 2.000000e+01 : f32
    %28 = vector.broadcast %cst_11 : f32 to vector<32x256xf32>
    %29 = arith.minimumf %27, %28 : vector<32x256xf32>
    %cst_12 = arith.constant 2.000000e+01 : f32
    %30 = vector.broadcast %cst_12 : f32 to vector<32x256xf32>
    %31 = arith.cmpf ogt, %27, %30 : vector<32x256xf32>
    %32 = math.exp %29 : vector<32x256xf32>
    %33 = math.log1p %32 : vector<32x256xf32>
    %34 = arith.select %31, %27, %33 : vector<32x256xi1>, vector<32x256xf32>
    %c0_13 = arith.constant 0 : index
    %c0_14 = arith.constant 0 : index
    %35 = vector.load %arg6[%c0_13, %c0_14] : memref<32x2xf32, #tpu.memory_space<vmem>>, vector<32x2xf32>
    %36 = vector.extract_strided_slice %35 {offsets = [0, 0], sizes = [32, 1], strides = [1, 1]} : vector<32x2xf32> to vector<32x1xf32>
    %37 = vector.broadcast %36 : vector<32x1xf32> to vector<32x256xf32>
    %38 = arith.mulf %34, %37 : vector<32x256xf32>
    %cst_15 = arith.constant dense<0.000000e+00> : vector<256xf32>
    %39 = vector.multi_reduction <add>, %38, %cst_15 [0] : vector<32x256xf32> to vector<256xf32>
    %40 = vector.shape_cast %39 : vector<256xf32> to vector<1x256xf32>
    %c0_16 = arith.constant 0 : index
    %c0_17 = arith.constant 0 : index
    %41 = vector.load %arg7[%c0_16, %c0_17] : memref<2x1xf32, #tpu.memory_space<vmem>>, vector<1x1xf32>
    %42 = vector.broadcast %41 : vector<1x1xf32> to vector<1x256xf32>
    %43 = arith.addf %40, %42 : vector<1x256xf32>
    %c0_18 = arith.constant 0 : index
    %c0_19 = arith.constant 0 : index
    %44 = vector.load %arg8[%c0_18, %c0_19] : memref<2x256xf32, #tpu.memory_space<vmem>>, vector<1x256xf32>
    tpu.vector_store %arg8[%c0_18, %c0_19], %43 {strides = array<i32>} : memref<2x256xf32, #tpu.memory_space<vmem>>, vector<1x256xf32>,
    %45 = vector.extract_strided_slice %35 {offsets = [0, 1], sizes = [32, 1], strides = [1, 1]} : vector<32x2xf32> to vector<32x1xf32>
    %46 = vector.broadcast %45 : vector<32x1xf32> to vector<32x256xf32>
    %47 = arith.mulf %34, %46 : vector<32x256xf32>
    %cst_20 = arith.constant dense<0.000000e+00> : vector<256xf32>
    %48 = vector.multi_reduction <add>, %47, %cst_20 [0] : vector<32x256xf32> to vector<256xf32>
    %49 = vector.shape_cast %48 : vector<256xf32> to vector<1x256xf32>
    %c1 = arith.constant 1 : index
    %c0_21 = arith.constant 0 : index
    %50 = vector.load %arg7[%c1, %c0_21] : memref<2x1xf32, #tpu.memory_space<vmem>>, vector<1x1xf32>
    %51 = vector.broadcast %50 : vector<1x1xf32> to vector<1x256xf32>
    %52 = arith.addf %49, %51 : vector<1x256xf32>
    %c1_22 = arith.constant 1 : index
    %c0_23 = arith.constant 0 : index
    %53 = vector.load %arg8[%c1_22, %c0_23] : memref<2x256xf32, #tpu.memory_space<vmem>>, vector<1x256xf32>
    tpu.vector_store %arg8[%c1_22, %c0_23], %52 {strides = array<i32>} : memref<2x256xf32, #tpu.memory_space<vmem>>, vector<1x256xf32>,
    return
  }
  func.func @transform_0(%arg0: i32) -> (i32, i32) {
    %c0_i32 = arith.constant 0 : i32
    %c0_i32_0 = arith.constant 0 : i32
    return %c0_i32, %arg0 : i32, i32
  }
  func.func @transform_1(%arg0: i32) -> (i32, i32) {
    %c0_i32 = arith.constant 0 : i32
    %c0_i32_0 = arith.constant 0 : i32
    %c0_i32_1 = arith.constant 0 : i32
    return %c0_i32, %c0_i32_0 : i32, i32
  }
  func.func @transform_2(%arg0: i32) -> (i32, i32) {
    %c0_i32 = arith.constant 0 : i32
    %c0_i32_0 = arith.constant 0 : i32
    %c0_i32_1 = arith.constant 0 : i32
    return %c0_i32, %c0_i32_0 : i32, i32
  }
  func.func @transform_3(%arg0: i32) -> (i32, i32) {
    %c0_i32 = arith.constant 0 : i32
    %c0_i32_0 = arith.constant 0 : i32
    %c0_i32_1 = arith.constant 0 : i32
    return %c0_i32, %c0_i32_0 : i32, i32
  }
  func.func @transform_4(%arg0: i32) -> (i32, i32) {
    %c0_i32 = arith.constant 0 : i32
    %c0_i32_0 = arith.constant 0 : i32
    %c0_i32_1 = arith.constant 0 : i32
    return %c0_i32, %c0_i32_0 : i32, i32
  }
  func.func @transform_5(%arg0: i32) -> (i32, i32) {
    %c0_i32 = arith.constant 0 : i32
    %c0_i32_0 = arith.constant 0 : i32
    %c0_i32_1 = arith.constant 0 : i32
    return %c0_i32, %c0_i32_0 : i32, i32
  }
  func.func @transform_6(%arg0: i32) -> (i32, i32) {
    %c0_i32 = arith.constant 0 : i32
    %c0_i32_0 = arith.constant 0 : i32
    %c0_i32_1 = arith.constant 0 : i32
    return %c0_i32, %c0_i32_0 : i32, i32
  }
  func.func @transform_7(%arg0: i32) -> (i32, i32) {
    %c0_i32 = arith.constant 0 : i32
    %c0_i32_0 = arith.constant 0 : i32
    return %c0_i32, %arg0 : i32, i32
  }
}

</mosaic_0001>

<bundles_post_ra>
// kernel: tpu_custom_call.1
= control target key start
LH: loop header
LB: loop body
LE: loop exit
PB: predicated region body
PF: predicated region fallthrough
CT: control target
= control target key end

     0   :  { %12 = vsyncpa [#allocation3], 0  ;;  %s1635_s0 = inlined_call_operand.vmem [shape: f32[2,1024], index: 0, kind: input, shape index: {}]   ;;  %s1636_s1 = inlined_call_operand.vmem [shape: f32[32,2], index: 1, kind: input, shape index: {}]   ;;  %s1637_s2 = inlined_call_operand.vmem [shape: f32[32,1], index: 2, kind: input, shape index: {}]   ;;  %s1638_s3 = inlined_call_operand.vmem [shape: f32[32,32], index: 3, kind: input, shape index: {}]   ;;  %s1639_s4 = inlined_call_operand.vmem [shape: f32[32,1], index: 4, kind: input, shape index: {}]   ;;  %s1640_s5 = inlined_call_operand.vmem [shape: f32[32,2], index: 5, kind: input, shape index: {}]   ;;  %s1641_s6 = inlined_call_operand.vmem [shape: f32[2,1], index: 6, kind: input, shape index: {}]   ;;  %s1642_s7 = inlined_call_operand.hbm [shape: f32[2,1024], index: 7, kind: output, shape index: {}]  }
   0x1   :  { %14 = vsyncpa [#allocation3 + $0x1], 0  ;;  %s1251_s24 = smov 0   ;;  %s1253_s25 = smov 0  }
   0x2   :  { %s1255_s26 = smov 0   ;;  %s1257_s27 = smov 0  }
   0x3 LB: > { %s1272_s28 = sadd.s32 4294967295, %s1204_s27   ;;  %s993_s29 = sadd.s32 4294967294, %s1204_s27   ;;  %s1204_s27 = sphi %s1257_s27, %s1672_s27   ;;  %s1200_s26 = sphi %s1255_s26, %s1671_s26   ;;  %s1196_s25 = sphi %s1253_s25, %s1670_s25   ;;  %s1192_s24 = sphi %s1251_s24, %s1669_s24  }
   0x4   : > { %s1276_s30 = sadd.s32 1, %s1204_s27   ;;  %s179_s8 = sadd.s32 1, %s1200_s26 }
   0x5   : > { %s176_s9 = ssub.s32 %s1204_s27, %s1276_s30  ;;  %p189_p0 = scmp.ne.s32.totalorder %s1200_s26, %s1196_s25 }
   0x6   : > { %p177_p1 = scmp.eq.s32.totalorder %s176_s9, 0  ;;  %p190_p2 = scmp.eq.s32.totalorder %s1272_s28, 3 }
   0x7   : > { %p195_p3 = scmp.ne.s32.totalorder %s1196_s25, %s1192_s24  ;;  %p196_p4 = scmp.eq.s32.totalorder %s993_s29, 3 }
   0x8   : > { %s1287_s10 = scalar_select %p177_p1, %s1200_s26, %s179_s8  }
   0x9   : > { %p1289_p5 = por %p190_p2, %p189_p0  ;;  %p1293_p6 = por %p196_p4, %p195_p3 }
   0xa   : > { %p996_p7 = scmp.ge.s32.totalorder %s1204_s27, 1  ;;  %p241_p8 = scmp.lt.s32.totalorder %s1204_s27, 5 }
   0xc   : > { %p242_p9 = pnand %p996_p7, %p241_p8 }
   0xd   : > { %v332_v0 = vld [vmem:[%s1637_s2] sm:$0xff] (!%p242_p9)  ;;  %v1206_v2 = vmov (!%p242_p9), 0   ;;  %v333_v3 = vld [vmem:[%s1637_s2 + $0x8] sm:$0xff] (!%p242_p9)  ;;  %v284_v5 = vld [vmem:[%s1636_s1 + $0x18] sm:$0xff] (!%p242_p9)  ;;  %v1207_v6 = vmov (!%p242_p9), 1   ;;  %v1208_v10 = vmov (!%p242_p9), 0.0   ;;  %v306_v21 = vlaneseq (!%p242_p9) }
   0xe   : > { %245 = sbr.rel (%p242_p9) target bundleno = 508 (0x1fc), region = 48  ;;  %v281_v1 = vld [vmem:[%s1636_s1] sm:$0xff] (!%p242_p9)  ;;  %1067 = vset.pattern.permute.xlu1 (!%p242_p9), %v1206_v2  ;;  %1066 = vset.pattern.permute.xlu0 (!%p242_p9), %v1206_v2  ;;  %v282_v4 = vld [vmem:[%s1636_s1 + $0x8] sm:$0xff] (!%p242_p9)  ;;  %v283_v7 = vld [vmem:[%s1636_s1 + $0x10] sm:$0xff] (!%p242_p9)  ;;  %s998_s21 = sshll.u32 (!%p242_p9), %s1272_s28, 1 }
   0xf   : > { %338 = vperm.xlu1 (!%p242_p9), %1067, %v332_v0   ;;  %287 = vperm.xlu0 (!%p242_p9), %1066, %v281_v1   ;;  %v334_v8 = vld [vmem:[%s1637_s2 + $0x10] sm:$0xff] (!%p242_p9)  ;;  %v335_v9 = vld [vmem:[%s1637_s2 + $0x18] sm:$0xff] (!%p242_p9)  ;;  %v530_v11 = vld [vmem:[%s1639_s4] sm:$0xff] (!%p242_p9)  ;;  %p274_p10 = scmp.lt.s32.totalorder (!%p242_p9), %s998_s21, 7  ;;  %v1357_v22 = vshrl.u32 (!%p242_p9), %v306_v21, 7  ;;  %s270_s20 = sand.u32 (!%p242_p9), 1, %s1196_s25  }
  0x10   : > { %631 = vmatprep.mubr.f32.mxu0 (!%p242_p9), %v1208_v10  ;;  %643 = vmatprep.mubr.f32.mxu1 (!%p242_p9), %v1208_v10  ;;  %v531_v12 = vld [vmem:[%s1639_s4 + $0x8] sm:$0xff] (!%p242_p9)  ;;  %v532_v13 = vld [vmem:[%s1639_s4 + $0x10] sm:$0xff] (!%p242_p9)  ;;  %v768_v14 = vld [vmem:[%s1640_s5] sm:$0xff] (!%p242_p9)  ;;  %s1210_s15 = smov (!%p242_p9), [#allocation2]  }
  0x11   : > { %v533_v15 = vld [vmem:[%s1639_s4 + $0x18] sm:$0xff] (!%p242_p9)  ;;  %v769_v16 = vld [vmem:[%s1640_s5 + $0x8] sm:$0xff] (!%p242_p9)  ;;  %v770_v17 = vld [vmem:[%s1640_s5 + $0x10] sm:$0xff] (!%p242_p9)  ;;  %v308_v23 = vsub.s32 (!%p242_p9), 0, %v1357_v22  ;;  %v312_v24 = vsub.s32 (!%p242_p9), 2, %v1357_v22  ;;  %v382_v26 = vsub.s32 (!%p242_p9), 1, %v1357_v22 }
  0x12   : > { %v771_v18 = vld [vmem:[%s1640_s5 + $0x18] sm:$0xff] (!%p242_p9)  ;;  %v891_v19 = vld [vmem:[%s1641_s6 + $0x1] sm:$0x1] (!%p242_p9)  ;;  %v818_v20 = vld [vmem:[%s1641_s6] sm:$0x1] (!%p242_p9)  ;;  %v386_v27 = vsub.s32 (!%p242_p9), 3, %v1357_v22 }
  0x13   : > { %343 = vperm.xlu1 (!%p242_p9), %1067, %v333_v3   ;;  %292 = vperm.xlu0 (!%p242_p9), %1066, %v282_v4   ;;  %s1146_s16 = sshll.u32 (!%p242_p9), %s1210_s15, 4  ;;  %s1147_s16 = int_to_ptr.vmem [resolvable:$false] %s1146_s16 }
  0x14   : > { %s1148_s17 = scalar_lea.vmem (!%p242_p9), %s1147_s16, 128 }
  0x15   : > { %s1674_s21 = smov (!%p274_p10, %s998_s21), 7 }
  0x16   : > { %s999_s22 = sshll.u32 %s1674_s21, 1  ;;  %s997_s21 = sshll.u32 %s270_s20, 2 }
  0x17   : > { %1068 = vset.pattern.permute.xlu1 %v1207_v6  ;;  %302 = vperm.xlu0 %1066, %v284_v5   ;;  %s277_s8 = scalar_lea.vmem %s1635_s0, %s999_s22  ;;  %s1010_s22 = sshll.u32 %s1272_s28, 6 }
  0x18   : > { %369 = vperm.xlu1 %1068, %v282_v4   ;;  %v280_v25 = vld [vmem:[%s277_s8] sm:$0xf]  ;;  %s272_s23 = scalar_lea.vmem [#allocation2], %s997_s21  ;;  %s1591_s13 = scalar_lea.hbm %s1642_s7, %s1010_s22 }
  0x19   : > { %v309_v30 = vrot.slane %v280_v25, %v308_v23  ;;  %v313_v31 = vrot.slane %v280_v25, %v312_v24  ;;  %v383_v32 = vrot.slane %v280_v25, %v382_v26  ;;  %v387_v33 = vrot.slane %v280_v25, %v386_v27  ;;  %s934_s29 = sshll.u32 %s272_s23, 4  ;;  %s920_s28 = scalar_lea.sflag [#allocation3], %s270_s20  ;;  %s1593_s29 = int_to_ptr.vmem [resolvable:$true] %s934_s29 }
  0x1a   : > { %s1142_s14 = scalar_lea.vmem %s1593_s29, 64  ;;  %p1149_p0 = scmp.lt.s32.totalorder %s1593_s29, %s1147_s16 }
  0x1b   : > { %1070 = vset.pattern.permute.xlu0 %v1207_v6  ;;  %v319_v34 = vrot.slane %v309_v30, %v308_v23  ;;  %v323_v35 = vrot.slane %v313_v31, %v308_v23  ;;  %v393_v40 = vrot.slane %v383_v32, %v382_v26  ;;  %v397_v41 = vrot.slane %v387_v33, %v382_v26  ;;  %p1143_p11 = scmp.ne.s32.totalorder %s1593_s29, %s1142_s14  ;;  %p1150_p1 = scmp.lt.s32.totalorder %s1148_s17, %s1142_s14 }
  0x1c   : > { %1069 = vset.pattern.permute.xlu1 %v1206_v2  ;;  %365 = vperm.xlu0 %1070, %v281_v1  }
  0x1d   : > { %297 = vperm.xlu1 %1069, %v283_v7   ;;  %p1144_p12 = pnand %p1143_p11, %p1289_p5  ;;  %p1151_p2 = por %p1150_p1, %p1149_p0 }
  0x1f   : > { %p1145_p13 = pneg %p1144_p12 }
  0x20   : > { %373 = vperm.xlu0 %1070, %v283_v7  }
  0x21   : > { %348 = vperm.xlu1 %1069, %v334_v8   ;;  %p1152_p3 = pnand %p1151_p2, %p1145_p13 }
  0x24   : > { %1073 = vset.pattern.permute.xlu0 %v1206_v2 }
  0x25   : > { %353 = vperm.xlu1 %1069, %v335_v9   ;;  %541 = vperm.xlu0 %1073, %v531_v12  }
  0x29   : > { %1071 = vset.pattern.permute.xlu1 %v1207_v6  ;;  %774 = vperm.xlu0 %1073, %v768_v14  }
  0x2a   : > { %377 = vperm.xlu1 %1071, %v284_v5  }
  0x2d   : > { %1074 = vset.pattern.permute.xlu0 %v1207_v6 }
  0x2e   : > { %1072 = vset.pattern.permute.xlu1 %v1206_v2  ;;  %850 = vperm.xlu0 %1074, %v768_v14  }
  0x2f   : > { %536 = vperm.xlu1 %1072, %v530_v11  }
  0x32   : > { %858 = vperm.xlu0 %1074, %v770_v17  }
  0x33   : > { %546 = vperm.xlu1 %1072, %v532_v13  }
  0x36   : > { %862 = vperm.xlu0 %1074, %v771_v18  }
  0x37   : > { %551 = vperm.xlu1 %1072, %v533_v15  }
  0x3a   : > { %1077 = vset.pattern.permute.xlu0 %v1206_v2 }
  0x3b   : > { %779 = vperm.xlu1 %1072, %v769_v16   ;;  %894 = vperm.xlu0 %1077, %v891_v19  }
  0x3f   : > { %1075 = vset.pattern.permute.xlu1 %v1207_v6 }
  0x40   : > { %854 = vperm.xlu1 %1075, %v769_v16  }
  0x44   : > { %1076 = vset.pattern.permute.xlu1 %v1206_v2 }
  0x45   : > { %784 = vperm.xlu1 %1076, %v770_v17  }
  0x49   : > { %789 = vperm.xlu1 %1076, %v771_v18  }
  0x4d   : > { %821 = vperm.xlu1 %1076, %v818_v20  }
  0x8e   : > { %v339_v28 = vpop.permute.xlu1 %338  ;;  %v288_v29 = vpop.permute.xlu0 %287 }
  0x8f   : > { %v324_v43 = vmul.f32 %v319_v34, %v288_v29  ;;  %v325_v44 = vmul.f32 %v323_v35, %v288_v29 }
  0x91   : > { %v356_v52 = vadd.f32 %v339_v28, %v324_v43  ;;  %v357_v53 = vadd.f32 %v339_v28, %v325_v44 }
  0x92   : > { %v344_v36 = vpop.permute.xlu1 %343  ;;  %v293_v37 = vpop.permute.xlu0 %292 }
  0x93   : > { %v326_v38 = vmul.f32 %v319_v34, %v293_v37  ;;  %v327_v39 = vmul.f32 %v323_v35, %v293_v37 }
  0x95   : > { %v358_v46 = vadd.f32 %v344_v36, %v326_v38  ;;  %v359_v47 = vadd.f32 %v344_v36, %v327_v39 }
  0x96   : > { %v303_v42 = vpop.permute.xlu0 %302 }
  0x97   : > { %v370_v45 = vpop.permute.xlu1 %369  ;;  %v330_v18 = vmul.f32 %v319_v34, %v303_v42  ;;  %v331_v23 = vmul.f32 %v323_v35, %v303_v42 }
  0x98   : > { %v400_v48 = vmul.f32 %v393_v40, %v370_v45  ;;  %v401_v49 = vmul.f32 %v397_v41, %v370_v45 }
  0x9a   : > { %v1366_v50 = vadd.f32 %v400_v48, %v358_v46  ;;  %v1368_v51 = vadd.f32 %v401_v49, %v359_v47 }
  0x9b   : > { %v366_v54 = vpop.permute.xlu0 %365 }
  0x9c   : > { %v416_v55 = vmin.f32 %v1366_v50, 20.0  ;;  %v417_v56 = vmin.f32 %v1368_v51, 20.0  ;;  %v398_v57 = vmul.f32 %v393_v40, %v366_v54  ;;  %v399_v58 = vmul.f32 %v397_v41, %v366_v54  ;;  %v298_v59 = vpop.permute.xlu1 %297 }
  0x9d   : > { %v328_v0 = vmul.f32 %v319_v34, %v298_v59  ;;  %v329_v1 = vmul.f32 %v323_v35, %v298_v59  ;;  %vm425_vm0 = vcmp.gt.f32.partialorder %v1368_v51, 20.0  ;;  %vm424_vm6 = vcmp.gt.f32.partialorder %v1366_v50, 20.0 }
  0x9e   : > { %v434_v60 = vmul.f32 1.442695, %v416_v55  ;;  %v436_v61 = vmul.f32 1.442695, %v417_v56  ;;  %v1372_v62 = vadd.f32 %v398_v57, %v356_v52  ;;  %v1374_v63 = vadd.f32 %v399_v58, %v357_v53 }
  0x9f   : > { %v374_v2 = vpop.permute.xlu0 %373 }
  0xa0   : > { %1078 = vpow2.f32 %v434_v60  ;;  %v414_v3 = vmin.f32 %v1372_v62, 20.0  ;;  %v415_v4 = vmin.f32 %v1374_v63, 20.0  ;;  %v349_v5 = vpop.permute.xlu1 %348  ;;  %v402_v6 = vmul.f32 %v393_v40, %v374_v2 }
  0xa1   : > { %1080 = vpow2.f32 %v436_v61  ;;  %v360_v7 = vadd.f32 %v349_v5, %v328_v0  ;;  %v361_v8 = vadd.f32 %v349_v5, %v329_v1  ;;  %v403_v9 = vmul.f32 %v397_v41, %v374_v2 }
  0xa2   : > { %v430_v11 = vmul.f32 1.442695, %v414_v3  ;;  %v432_v12 = vmul.f32 1.442695, %v415_v4  ;;  %vm422_vm1 = vcmp.gt.f32.partialorder %v1372_v62, 20.0  ;;  %vm423_vm7 = vcmp.gt.f32.partialorder %v1374_v63, 20.0 }
  0xa3   : > { %v1378_v13 = vadd.f32 %v402_v6, %v360_v7  ;;  %v1380_v14 = vadd.f32 %v403_v9, %v361_v8 }
  0xa4   : > { %1082 = vpow2.f32 %v430_v11  ;;  %v354_v15 = vpop.permute.xlu1 %353 }
  0xa5   : > { %1084 = vpow2.f32 %v432_v12  ;;  %v418_v16 = vmin.f32 %v1378_v13, 20.0  ;;  %v419_v17 = vmin.f32 %v1380_v14, 20.0  ;;  %v362_v24 = vadd.f32 %v354_v15, %v330_v18 }
  0xa6   : > { %v363_v27 = vadd.f32 %v354_v15, %v331_v23  ;;  %vm427_vm8 = vcmp.gt.f32.partialorder %v1380_v14, 20.0  ;;  %vm426_vm13 = vcmp.gt.f32.partialorder %v1378_v13, 20.0 }
  0xa7   : > { %v438_v19 = vmul.f32 1.442695, %v418_v16  ;;  %v440_v20 = vmul.f32 1.442695, %v419_v17 }
  0xa9   : > { %1086 = vpow2.f32 %v438_v19  ;;  %v378_v25 = vpop.permute.xlu1 %377 }
  0xaa   : > { %v1079_v26 = vpop.eup %1078  ;;  %1088 = vpow2.f32 %v440_v20  ;;  %v404_v28 = vmul.f32 %v393_v40, %v378_v25  ;;  %v405_v29 = vmul.f32 %v397_v41, %v378_v25 }
  0xab   : > { %v1081_v30 = vpop.eup %1080  ;;  %v464_v31 = vadd.f32 1.0, %v1079_v26  ;;  %v467_v46 = vmul.f32 -0.5, %v1079_v26  ;;  %v470_v54 = vand.u32 2147483647, %v1079_v26 }
  0xac   : > { %v1384_v32 = vadd.f32 %v404_v28, %v362_v24  ;;  %v1386_v33 = vadd.f32 %v405_v29, %v363_v27  ;;  %v473_v36 = vadd.f32 1.0, %v1081_v30  ;;  %v476_v47 = vmul.f32 -0.5, %v1081_v30 }
  0xad   : > { %1090 = vlog2.f32 %v464_v31  ;;  %v468_v57 = vadd.f32 1.0, %v467_v46  ;;  %v479_v59 = vand.u32 2147483647, %v1081_v30  ;;  %vm1398_vm2 = vcmp.lt.f32.partialorder %v470_v54, 0.0004427343 }
  0xae   : > { %v1083_v34 = vpop.eup %1082  ;;  %v420_v37 = vmin.f32 %v1384_v32, 20.0  ;;  %v421_v35 = vmin.f32 %v1386_v33, 20.0  ;;  %1092 = vlog2.f32 %v473_v36  ;;  %v477_v58 = vadd.f32 1.0, %v476_v47 }
  0xaf   : > { %v1085_v38 = vpop.eup %1084  ;;  %v446_v39 = vadd.f32 1.0, %v1083_v34  ;;  %v449_v45 = vmul.f32 -0.5, %v1083_v34  ;;  %v452_v60 = vand.u32 2147483647, %v1083_v34  ;;  %v469_v8 = vmul.f32 %v1079_v26, %v468_v57 }
  0xb0   : > { %v442_v42 = vmul.f32 1.442695, %v420_v37  ;;  %v444_v43 = vmul.f32 1.442695, %v421_v35  ;;  %v455_v40 = vadd.f32 1.0, %v1085_v38  ;;  %v458_v49 = vmul.f32 -0.5, %v1085_v38 }
  0xb1   : > { %1094 = vlog2.f32 %v446_v39  ;;  %v450_v56 = vadd.f32 1.0, %v449_v45  ;;  %v461_v5 = vand.u32 2147483647, %v1085_v38  ;;  %v478_v11 = vmul.f32 %v1081_v30, %v477_v58 }
  0xb2   : > { %1096 = vpow2.f32 %v442_v42  ;;  %v459_v61 = vadd.f32 1.0, %v458_v49  ;;  %vm1402_vm3 = vcmp.lt.f32.partialorder %v479_v59, 0.0004427343  ;;  %vm453_vm4 = vcmp.lt.f32.partialorder %v452_v60, 0.0004427343 }
  0xb3   : > { %v1390_v41 = vpop.eup %1086  ;;  %1098 = vpow2.f32 %v444_v43  ;;  %v451_v7 = vmul.f32 %v1083_v34, %v450_v56  ;;  %vm462_vm5 = vcmp.lt.f32.partialorder %v461_v5, 0.0004427343  ;;  %vm428_vm14 = vcmp.gt.f32.partialorder %v1384_v32, 20.0 }
  0xb4   : > { %v1392_v44 = vpop.eup %1088  ;;  %1100 = vlog2.f32 %v455_v40  ;;  %v482_v48 = vadd.f32 1.0, %v1390_v41  ;;  %v460_v17 = vmul.f32 %v1085_v38, %v459_v61  ;;  %v485_v26 = vmul.f32 -0.5, %v1390_v41 }
  0xb5   : > { %v491_v52 = vadd.f32 1.0, %v1392_v44  ;;  %v494_v29 = vmul.f32 -0.5, %v1392_v44  ;;  %vm429_vm15 = vcmp.gt.f32.partialorder %v1386_v33, 20.0 }
  0xb6   : > { %1102 = vlog2.f32 %v482_v48  ;;  %v486_v39 = vadd.f32 1.0, %v485_v26 }
  0xb7   : > { %v1091_v53 = vpop.eup %1090  ;;  %1104 = vlog2.f32 %v491_v52  ;;  %v495_v42 = vadd.f32 1.0, %v494_v29 }
  0xb8   : > { %v1093_v55 = vpop.eup %1092  ;;  %v466_v0 = vmul.f32 0.6931472, %v1091_v53  ;;  %v487_v48 = vmul.f32 %v1390_v41, %v486_v39 }
  0xb9   : > { %v475_v2 = vmul.f32 0.6931472, %v1093_v55  ;;  %v496_v52 = vmul.f32 %v1392_v44, %v495_v42 }
  0xba   : > { %v472_v19 = vsel %vm1398_vm2, %v469_v8, %v466_v0 }
  0xbb   : > { %v1095_v1 = vpop.eup %1094  ;;  %v481_v24 = vsel %vm1402_vm3, %v478_v11, %v475_v2  ;;  %v520_v28 = vsel %vm424_vm6, %v1366_v50, %v472_v19  ;;  %v488_v50 = vand.u32 2147483647, %v1390_v41 }
  0xbc   : > { %v1097_v4 = vpop.eup %1096  ;;  %v448_v6 = vmul.f32 0.6931472, %v1095_v1 }
  0xbd   : > { %v1099_v9 = vpop.eup %1098  ;;  %v500_v15 = vadd.f32 1.0, %v1097_v4  ;;  %v503_v36 = vmul.f32 -0.5, %v1097_v4  ;;  %v506_v46 = vand.u32 2147483647, %v1097_v4  ;;  %vm1427_vm9 = vcmp.lt.f32.partialorder %v488_v50, 0.0004427343 }
  0xbe   : > { %v1101_v16 = vpop.eup %1100  ;;  %v454_v18 = vsel %vm453_vm4, %v451_v7, %v448_v6  ;;  %v509_v20 = vadd.f32 1.0, %v1099_v9  ;;  %v512_v35 = vmul.f32 -0.5, %v1099_v9  ;;  %v515_v47 = vand.u32 2147483647, %v1099_v9  ;;  %v526_v6 = vld [vmem:[%s1638_s3] sm:$0xff] }
  0xbf   : > { %v457_v23 = vmul.f32 0.6931472, %v1101_v16  ;;  %v518_v25 = vsel %vm422_vm1, %v1372_v62, %v454_v18  ;;  %1106 = vlog2.f32 %v500_v15  ;;  %v521_v62 = vsel %vm425_vm0, %v1368_v51, %v481_v24 }
  0xc0   : > { %1108 = vlog2.f32 %v509_v20  ;;  %v1013_v31 = vpack.c.bf16 %v520_v28, %v518_v25  ;;  %v1103_v34 = vpop.eup %1102  ;;  %v504_v40 = vadd.f32 1.0, %v503_v36  ;;  %v513_v51 = vadd.f32 1.0, %v512_v35 }
  0xc1   : > { %v463_v27 = vsel %vm462_vm5, %v460_v17, %v457_v23  ;;  %v1105_v38 = vpop.eup %1104  ;;  %v484_v43 = vmul.f32 0.6931472, %v1103_v34  ;;  %vm507_vm11 = vcmp.lt.f32.partialorder %v506_v46, 0.0004427343  ;;  %vm516_vm12 = vcmp.lt.f32.partialorder %v515_v47, 0.0004427343  ;;  %v542_v23 = vpop.permute.xlu0 %541 }
  0xc2   : > { %v519_v30 = vsel %vm423_vm7, %v1374_v63, %v463_v27  ;;  %v497_v63 = vand.u32 2147483647, %v1392_v44  ;;  %v493_v45 = vmul.f32 0.6931472, %v1105_v38  ;;  %v505_v58 = vmul.f32 %v1097_v4, %v504_v40 }
  0xc3   : > { %v1011_v37 = vpack.c.bf16 %v521_v62, %v519_v30  ;;  %v490_v56 = vsel %vm1427_vm9, %v487_v48, %v484_v43  ;;  %v514_v60 = vmul.f32 %v1099_v9, %v513_v51  ;;  %vm554_vm0 = vcmask 261120  }
  0xc4   : > { %vm1431_vm10 = vcmp.lt.f32.partialorder %v497_v63, 0.0004427343  ;;  %v522_v0 = vsel %vm426_vm13, %v1378_v13, %v490_v56  ;;  %v528_v13 = vld [vmem:[%s1638_s3 + $0x10] sm:$0xff] }
  0xc5   : > { %1012 = vmatprep.subr.bf16.mxu0 %v1011_v37  ;;  %1019 = vmatprep.subr.bf16.mxu1 %v1011_v37  ;;  %v499_v41 = vsel %vm1431_vm10, %v496_v52, %v493_v45 }
  0xc6   : > { %1014 = vmatpush1.bf16.msra.mxu0 %v1013_v31  ;;  %1021 = vmatpush1.bf16.msra.mxu1 %v1013_v31  ;;  %v523_v2 = vsel %vm427_vm8, %v1380_v14, %v499_v41  ;;  %v527_v14 = vld [vmem:[%s1638_s3 + $0x8] sm:$0xff] }
  0xc9   : > { %v1107_v49 = vpop.eup %1106 }
  0xca   : > { %v1109_v54 = vpop.eup %1108  ;;  %v502_v57 = vmul.f32 0.6931472, %v1107_v49 }
  0xcb   : > { %v511_v59 = vmul.f32 0.6931472, %v1109_v54 }
  0xcc   : > { %v508_v44 = vsel %vm507_vm11, %v505_v58, %v502_v57 }
  0xcd   : > { %v517_v61 = vsel %vm516_vm12, %v514_v60, %v511_v59  ;;  %v524_v1 = vsel %vm428_vm14, %v1384_v32, %v508_v44  ;;  %v529_v32 = vld [vmem:[%s1638_s3 + $0x18] sm:$0xff] }
  0xce   : > { %v525_v3 = vsel %vm429_vm15, %v1386_v33, %v517_v61  ;;  %v1017_v4 = vpack.c.bf16 %v524_v1, %v522_v0  ;;  %v537_v33 = vpop.permute.xlu1 %536 }
  0xcf   : > { %v1015_v5 = vpack.c.bf16 %v525_v3, %v523_v2 }
  0xd1   : > { %1016 = vmatprep.subr.bf16.mxu0 %v1015_v5  ;;  %1020 = vmatprep.subr.bf16.mxu1 %v1015_v5 }
  0xd2   : > { %1018 = vmatpush1.bf16.msra.mxu0 %v1017_v4  ;;  %1022 = vmatpush1.bf16.msra.mxu1 %v1017_v4  ;;  %v547_v7 = vpop.permute.xlu1 %546 }
  0xd5   : > { %1000 = vmatmul.mubr.msk.f32.vlgmr.msra.gmra.mrb[0].mxu0 %vm554_vm0, %v526_v6  ;;  %1002 = vmatmul.mubr.msk.f32.vlgmr.msra.gmra.mrb[0].mxu1 %vm554_vm0, %v528_v13 }
  0xd6   : > { %637 = vmatprep.mubr.f32.mxu0 %v1208_v10  ;;  %649 = vmatprep.mubr.f32.mxu1 %v1208_v10  ;;  %v552_v18 = vpop.permute.xlu1 %551 }
  0xd9   : > { %1001 = vmatmul.mubr.msk.f32.gmra.mrb[2].mxu0 %vm554_vm0, %v527_v14  ;;  %1003 = vmatmul.mubr.msk.f32.gmra.mrb[2].mxu1 %vm554_vm0, %v529_v32 }
 0x1a8   : > { %v633_v8 = vpop.f32.mrb[0].mxu0  ;;  %v645_v9 = vpop.f32.mrb[0].mxu1 }
 0x1a9   : > { %v1462_v11 = vadd.f32 %v633_v8, %v537_v33  ;;  %v1464_v12 = vadd.f32 %v645_v9, %v547_v7  ;;  %v635_v15 = vpop.f32.mrb[1].mxu0  ;;  %v647_v10 = vpop.f32.mrb[1].mxu1 }
 0x1aa   : > { %v1466_v16 = vadd.f32 %v635_v15, %v537_v33  ;;  %v1468_v17 = vadd.f32 %v647_v10, %v547_v7 }
 0x1ab   : > { %v656_v19 = vmin.f32 %v1462_v11, 20.0  ;;  %v660_v20 = vmin.f32 %v1464_v12, 20.0  ;;  %vm664_vm1 = vcmp.gt.f32.partialorder %v1462_v11, 20.0  ;;  %vm668_vm5 = vcmp.gt.f32.partialorder %v1464_v12, 20.0 }
 0x1ac   : > { %v657_v24 = vmin.f32 %v1466_v16, 20.0  ;;  %v661_v25 = vmin.f32 %v1468_v17, 20.0  ;;  %v639_v26 = vpop.f32.mrb[2].mxu0  ;;  %v651_v27 = vpop.f32.mrb[2].mxu1  ;;  %vm665_vm3 = vcmp.gt.f32.partialorder %v1466_v16, 20.0  ;;  %vm669_vm11 = vcmp.gt.f32.partialorder %v1468_v17, 20.0 }
 0x1ad   : > { %v672_v28 = vmul.f32 1.442695, %v656_v19  ;;  %v680_v29 = vmul.f32 1.442695, %v660_v20  ;;  %v1474_v30 = vadd.f32 %v639_v26, %v542_v23  ;;  %v1476_v62 = vadd.f32 %v651_v27, %v552_v18  ;;  %v641_v31 = vpop.f32.mrb[3].mxu0  ;;  %v653_v36 = vpop.f32.mrb[3].mxu1 }
 0x1ae   : > { %v674_v34 = vmul.f32 1.442695, %v657_v24  ;;  %v1478_v37 = vadd.f32 %v641_v31, %v542_v23  ;;  %v1480_v35 = vadd.f32 %v653_v36, %v552_v18  ;;  %v682_v42 = vmul.f32 1.442695, %v661_v25  ;;  %v1503_v18 = vpop.permute.xlu1 %779  ;;  %v775_v24 = vpop.permute.xlu0 %774 }
 0x1af   : > { %1110 = vpow2.f32 %v672_v28  ;;  %v658_v38 = vmin.f32 %v1474_v30, 20.0  ;;  %v662_v39 = vmin.f32 %v1476_v62, 20.0  ;;  %vm666_vm6 = vcmp.gt.f32.partialorder %v1474_v30, 20.0 }
 0x1b0   : > { %1112 = vpow2.f32 %v680_v29  ;;  %v659_v50 = vmin.f32 %v1478_v37, 20.0  ;;  %v663_v63 = vmin.f32 %v1480_v35, 20.0  ;;  %vm667_vm9 = vcmp.gt.f32.partialorder %v1478_v37, 20.0 }
 0x1b1   : > { %1114 = vpow2.f32 %v674_v34  ;;  %v676_v43 = vmul.f32 1.442695, %v658_v38  ;;  %v684_v40 = vmul.f32 1.442695, %v662_v39  ;;  %vm670_vm13 = vcmp.gt.f32.partialorder %v1476_v62, 20.0 }
 0x1b2   : > { %v678_v45 = vmul.f32 1.442695, %v659_v50  ;;  %v686_v51 = vmul.f32 1.442695, %v663_v63  ;;  %vm671_vm15 = vcmp.gt.f32.partialorder %v1480_v35, 20.0 }
 0x1b3   : > { %1116 = vpow2.f32 %v676_v43  ;;  %v855_v43 = vpop.permute.xlu1 %854 }
 0x1b4   : > { %1118 = vpow2.f32 %v682_v42 }
 0x1b5   : > { %1120 = vpow2.f32 %v678_v45 }
 0x1b6   : > { %1122 = vpow2.f32 %v684_v40 }
 0x1b7   : > { %1124 = vpow2.f32 %v686_v51 }
 0x1b9   : > { %v1111_v46 = vpop.eup %1110 }
 0x1ba   : > { %v1113_v47 = vpop.eup %1112  ;;  %v688_v48 = vadd.f32 1.0, %v1111_v46  ;;  %v691_v49 = vmul.f32 -0.5, %v1111_v46  ;;  %v694_v57 = vand.u32 2147483647, %v1111_v46 }
 0x1bb   : > { %v1115_v52 = vpop.eup %1114  ;;  %v724_v53 = vadd.f32 1.0, %v1113_v47  ;;  %v727_v54 = vmul.f32 -0.5, %v1113_v47  ;;  %v730_v13 = vand.u32 2147483647, %v1113_v47 }
 0x1bc   : > { %1126 = vlog2.f32 %v688_v48  ;;  %v697_v55 = vadd.f32 1.0, %v1115_v52  ;;  %v700_v58 = vmul.f32 -0.5, %v1115_v52  ;;  %v692_v59 = vadd.f32 1.0, %v691_v49 }
 0x1bd   : > { %v1117_v56 = vpop.eup %1116  ;;  %1128 = vlog2.f32 %v724_v53  ;;  %v703_v61 = vand.u32 2147483647, %v1115_v52  ;;  %v728_v0 = vadd.f32 1.0, %v727_v54  ;;  %vm1491_vm2 = vcmp.lt.f32.partialorder %v694_v57, 0.0004427343  ;;  %v851_v53 = vpop.permute.xlu0 %850 }
 0x1be   : > { %v1486_v41 = vpop.eup %1118  ;;  %1130 = vlog2.f32 %v697_v55  ;;  %v706_v60 = vadd.f32 1.0, %v1117_v56  ;;  %v701_v2 = vadd.f32 1.0, %v700_v58  ;;  %v709_v3 = vmul.f32 -0.5, %v1117_v56 }
 0x1bf   : > { %v1121_v44 = vpop.eup %1120  ;;  %v712_v6 = vand.u32 2147483647, %v1117_v56  ;;  %v693_v32 = vmul.f32 %v1111_v46, %v692_v59  ;;  %v733_v7 = vadd.f32 1.0, %v1486_v41  ;;  %vm1497_vm4 = vcmp.lt.f32.partialorder %v703_v61, 0.0004427343 }
 0x1c0   : > { %v1488_v1 = vpop.eup %1122  ;;  %1132 = vlog2.f32 %v706_v60  ;;  %v715_v4 = vadd.f32 1.0, %v1121_v44  ;;  %v718_v33 = vmul.f32 -0.5, %v1121_v44  ;;  %v729_v9 = vmul.f32 %v1113_v47, %v728_v0 }
 0x1c1   : > { %v1125_v14 = vpop.eup %1124  ;;  %v736_v15 = vmul.f32 -0.5, %v1486_v41  ;;  %v742_v10 = vadd.f32 1.0, %v1488_v1  ;;  %v702_v19 = vmul.f32 %v1115_v52, %v701_v2  ;;  %v710_v20 = vadd.f32 1.0, %v709_v3 }
 0x1c2   : > { %1134 = vlog2.f32 %v715_v4  ;;  %v745_v23 = vmul.f32 -0.5, %v1488_v1  ;;  %vm1508_vm7 = vcmp.lt.f32.partialorder %v712_v6, 0.0004427343  ;;  %v721_v26 = vand.u32 2147483647, %v1121_v44 }
 0x1c3   : > { %1136 = vlog2.f32 %v733_v7  ;;  %v751_v27 = vadd.f32 1.0, %v1125_v14  ;;  %v719_v29 = vadd.f32 1.0, %v718_v33  ;;  %vm1512_vm8 = vcmp.lt.f32.partialorder %v730_v13, 0.0004427343  ;;  %v785_v7 = vpop.permute.xlu1 %784 }
 0x1c4   : > { %1138 = vlog2.f32 %v742_v10  ;;  %v739_v36 = vand.u32 2147483647, %v1486_v41  ;;  %v754_v34 = vmul.f32 -0.5, %v1125_v14  ;;  %v737_v42 = vadd.f32 1.0, %v736_v15 }
 0x1c5   : > { %v748_v50 = vand.u32 2147483647, %v1488_v1  ;;  %1140 = vlog2.f32 %v751_v27  ;;  %v746_v45 = vadd.f32 1.0, %v745_v23  ;;  %v757_v46 = vand.u32 2147483647, %v1125_v14 }
 0x1c6   : > { %v1127_v28 = vpop.eup %1126  ;;  %v755_v51 = vadd.f32 1.0, %v754_v34  ;;  %v711_v49 = vmul.f32 %v1117_v56, %v710_v20  ;;  %vm1521_vm10 = vcmp.lt.f32.partialorder %v721_v26, 0.0004427343  ;;  %v720_v57 = vmul.f32 %v1121_v44, %v719_v29  ;;  %v859_v20 = vpop.permute.xlu0 %858 }
 0x1c7   : > { %v1129_v38 = vpop.eup %1128  ;;  %v690_v39 = vmul.f32 0.6931472, %v1127_v28  ;;  %vm1531_vm12 = vcmp.lt.f32.partialorder %v739_v36, 0.0004427343  ;;  %v738_v61 = vmul.f32 %v1486_v41, %v737_v42  ;;  %vm1539_vm14 = vcmp.lt.f32.partialorder %v748_v50, 0.0004427343 }
 0x1c8   : > { %v1131_v63 = vpop.eup %1130  ;;  %v726_v40 = vmul.f32 0.6931472, %v1129_v38  ;;  %v747_v2 = vmul.f32 %v1488_v1, %v746_v45  ;;  %v756_v3 = vmul.f32 %v1125_v14, %v755_v51  ;;  %vm1548_vm0 = vcmp.lt.f32.partialorder %v757_v46, 0.0004427343 }
 0x1c9   : > { %v696_v47 = vsel %vm1491_vm2, %v693_v32, %v690_v39  ;;  %v699_v48 = vmul.f32 0.6931472, %v1131_v63 }
 0x1ca   : > { %v1133_v54 = vpop.eup %1132  ;;  %v760_v55 = vsel %vm664_vm1, %v1462_v11, %v696_v47  ;;  %v732_v58 = vsel %vm1512_vm8, %v729_v9, %v726_v40  ;;  %vm846_vm1 = vcmp.lt.s32.totalorder %v306_v21, 256 }
 0x1cb   : > { %v705_v56 = vsel %vm1497_vm4, %v702_v19, %v699_v48  ;;  %v708_v60 = vmul.f32 0.6931472, %v1133_v54  ;;  %v792_v41 = vmul.f32 %v775_v24, %v760_v55  ;;  %v764_v13 = vsel %vm668_vm5, %v1464_v12, %v732_v58  ;;  %v863_v48 = vpop.permute.xlu0 %862 }
 0x1cc   : > { %v1135_v11 = vpop.eup %1134  ;;  %v761_v44 = vsel %vm665_vm3, %v1466_v16, %v705_v56  ;;  %v865_v14 = vmul.f32 %v851_v53, %v760_v55  ;;  %v796_v23 = vmul.f32 %v785_v7, %v764_v13 }
 0x1cd   : > { %v714_v5 = vsel %vm1508_vm7, %v711_v49, %v708_v60  ;;  %v717_v6 = vmul.f32 0.6931472, %v1135_v11  ;;  %v1137_v32 = vpop.eup %1136  ;;  %v793_v16 = vmul.f32 %v775_v24, %v761_v44  ;;  %v866_v33 = vmul.f32 %v851_v53, %v761_v44 }
 0x1ce   : > { %v762_v1 = vsel %vm666_vm6, %v1474_v30, %v714_v5  ;;  %v1139_v8 = vpop.eup %1138  ;;  %v735_v19 = vmul.f32 0.6931472, %v1137_v32  ;;  %v869_v24 = vmul.f32 %v859_v20, %v764_v13 }
 0x1cf   : > { %v723_v9 = vsel %vm1521_vm10, %v720_v57, %v717_v6  ;;  %v794_v15 = vmul.f32 %v1503_v18, %v762_v1  ;;  %v867_v10 = vmul.f32 %v855_v43, %v762_v1  ;;  %v744_v25 = vmul.f32 0.6931472, %v1139_v8  ;;  %v1141_v30 = vpop.eup %1140 }
 0x1d0   : > { %v763_v12 = vsel %vm667_vm9, %v1478_v37, %v723_v9  ;;  %v741_v29 = vsel %vm1531_vm12, %v738_v61, %v735_v19  ;;  %v753_v37 = vmul.f32 0.6931472, %v1141_v30 }
 0x1d1   : > { %v795_v26 = vmul.f32 %v1503_v18, %v763_v12  ;;  %v868_v27 = vmul.f32 %v855_v43, %v763_v12  ;;  %v873_v28 = vadd.f32 %v867_v10, %v865_v14  ;;  %v765_v31 = vsel %vm669_vm11, %v1468_v17, %v741_v29  ;;  %v790_v43 = vpop.permute.xlu1 %789 }
 0x1d2   : > { %v800_v36 = vadd.f32 %v794_v15, %v792_v41  ;;  %v750_v34 = vsel %vm1539_vm14, %v747_v2, %v744_v25  ;;  %v797_v39 = vmul.f32 %v785_v7, %v765_v31  ;;  %v870_v50 = vmul.f32 %v859_v20, %v765_v31  ;;  %v895_v15 = vpop.permute.xlu0 %894 }
 0x1d3   : > { %v882_v38 = vadd.f32 %v868_v27, %v866_v33  ;;  %v809_v42 = vadd.f32 %v795_v26, %v793_v16  ;;  %v874_v18 = vadd.f32 %v873_v28, %v869_v24  ;;  %v759_v40 = vsel %vm1548_vm0, %v756_v3, %v753_v37 }
 0x1d4   : > { %v801_v63 = vadd.f32 %v800_v36, %v796_v23  ;;  %v766_v45 = vsel %vm670_vm13, %v1476_v62, %v750_v34  ;;  %v767_v46 = vsel %vm671_vm15, %v1480_v35, %v759_v40  ;;  %v1209_v35 = vmov 1966171168  }
 0x1d5   : > { %v810_v17 = vadd.f32 %v809_v42, %v797_v39  ;;  %v883_v51 = vadd.f32 %v882_v38, %v870_v50  ;;  %v798_v47 = vmul.f32 %v790_v43, %v766_v45  ;;  %v799_v49 = vmul.f32 %v790_v43, %v767_v46  ;;  %v822_v10 = vpop.permute.xlu1 %821 }
 0x1d6   : > { %v871_v52 = vmul.f32 %v863_v48, %v766_v45  ;;  %v872_v53 = vmul.f32 %v863_v48, %v767_v46  ;;  %v830_v3 = vunpack.c.l.s4 %v1209_v35 }
 0x1d7   : > { %v802_v54 = vadd.f32 %v801_v63, %v798_v47  ;;  %v811_v55 = vadd.f32 %v810_v17, %v799_v49 }
 0x1d8   : > { %v875_v57 = vadd.f32 %v874_v18, %v871_v52  ;;  %v884_v58 = vadd.f32 %v883_v51, %v872_v53  ;;  %v831_v14 = vunpack.c.0.s8 %v830_v3 }
 0x1d9   : > { %v803_v59 = vrot.slane %v802_v54, 4  ;;  %v812_v56 = vrot.slane %v811_v55, 4 }
 0x1da   : > { %v876_v60 = vrot.slane %v875_v57, 4  ;;  %v885_v62 = vrot.slane %v884_v58, 4  ;;  %v834_v24 = vsub.s32 %v831_v14, %v1357_v22 }
 0x1db   : > { %v804_v61 = vadd.f32 %v803_v59, %v802_v54  ;;  %v813_v0 = vadd.f32 %v812_v56, %v811_v55 }
 0x1dc   : > { %v877_v11 = vadd.f32 %v876_v60, %v875_v57  ;;  %v886_v44 = vadd.f32 %v885_v62, %v884_v58 }
 0x1dd   : > { %v805_v2 = vrot.slane %v804_v61, 2  ;;  %v814_v4 = vrot.slane %v813_v0, 2 }
 0x1de   : > { %v878_v41 = vrot.slane %v877_v11, 2  ;;  %v887_v5 = vrot.slane %v886_v44, 2 }
 0x1df   : > { %v806_v6 = vadd.f32 %v805_v2, %v804_v61  ;;  %v815_v13 = vadd.f32 %v814_v4, %v813_v0 }
 0x1e0   : > { %v879_v32 = vadd.f32 %v878_v41, %v877_v11  ;;  %v888_v16 = vadd.f32 %v887_v5, %v886_v44 }
 0x1e1   : > { %v807_v1 = vrot.slane %v806_v6, 1  ;;  %v816_v33 = vrot.slane %v815_v13, 1 }
 0x1e2   : > { %v880_v7 = vrot.slane %v879_v32, 1  ;;  %v889_v8 = vrot.slane %v888_v16, 1 }
 0x1e3   : > { %v808_v9 = vadd.f32 %v807_v1, %v806_v6  ;;  %v817_v19 = vadd.f32 %v816_v33, %v815_v13 }
 0x1e4   : > { %v881_v20 = vadd.f32 %v880_v7, %v879_v32  ;;  %v890_v12 = vadd.f32 %v889_v8, %v888_v16 }
 0x1e5   : > { %v824_v23 = vadd.f32 %v822_v10, %v808_v9  ;;  %v825_v25 = vadd.f32 %v822_v10, %v817_v19 }
 0x1e6   : > { %v897_v30 = vadd.f32 %v895_v15, %v881_v20  ;;  %v898_v26 = vadd.f32 %v895_v15, %v890_v12 }
 0x1e7   : > { %v828_v27 = vcombine.low %v824_v23, %v825_v25 }
 0x1e8   : > { %v901_v28 = vcombine.low %v897_v30, %v898_v26 }
 0x1e9   : > { %v835_v29 = vrot.slane %v828_v27, %v834_v24 }
 0x1ea   : > { %v908_v31 = vrot.slane %v901_v28, %v834_v24 }
 0x1eb   : > { %v842_v36 = vrot.slane %v835_v29, %v834_v24 }
 0x1ec   : > { %v915_v34 = vrot.slane %v908_v31, %v834_v24 }
 0x1ed   : > { %848 = vst.msk [vmem:[%s272_s23] ss:$2 sm:$0x3] %vm846_vm1, %v842_v36 }
 0x1ee   : > { %1004 = vst.msk [vmem:[%s272_s23 + $0x1] ss:$2 sm:$0x3] %vm846_vm1, %v915_v34 }
 0x1ef   : > { %1155 = shalt.err (!%p1152_p3)
}
 0x1f0   : > { %s1156_s18 = scalar_lea.hbm %s1591_s13, 64  ;;  %s1160_s21 = scalar_lea.hbm %s1642_s7, 256 }
 0x1f1   : > { %p1157_p4 = scmp.ne.s32.totalorder %s1591_s13, %s1156_s18  ;;  %p1161_p9 = scmp.lt.u32.totalorder %s1591_s13, %s1642_s7 }
 0x1f2   : > { %p1162_p10 = scmp.lt.u32.totalorder %s1160_s21, %s1156_s18  ;;  %p1164_p12 = scmp.lt.u32.totalorder %s1156_s18, %s1591_s13 }
 0x1f3   : > { %p1158_p7 = pnand %p1157_p4, %p1289_p5 }
 0x1f4   : > { %p1163_p11 = por %p1162_p10, %p1161_p9 }
 0x1f5   : > { %p1159_p8 = pneg %p1158_p7 }
 0x1f6   : > { %p1165_p13 = por %p1164_p12, %p1163_p11 }
 0x1f8   : > { %p1166_p0 = pnand %p1165_p13, %p1159_p8 }
 0x1fa   : > { %1169 = shalt.err (!%p1166_p0)
}
 0x1fb   : > { %1023 = dma.vmem_to_hbm [thread:$0]  (%p1289_p5), %s1593_s29, 64, %s1591_s13, %s920_s28  }
 0x1fc PF: > { %p1029_p1 = scmp.ge.s32.totalorder %s1204_s27, 2  ;;  %s946_s8 = sand.u32 1, %s1192_s24  }
 0x1fd   : > { %s947_s9 = scalar_lea.sflag [#allocation3], %s946_s8 }
 0x1fe   : > { %p1026_p2 = pnand %p1029_p1, %p1293_p6 }
 0x200   : > { %1187 = dma.done.wait (!%p1026_p2), %s947_s9, 64  }
 0x201   : > { %1189 = vsyncadd (!%p1026_p2), %s947_s9, 4294967232  ;;  %p17_p3 = scmp.ge.s32.totalorder %s1276_s30, 6   ;;  %s1669_s24 = smov %s1196_s25 }
 0x202   : > { %s1670_s25 = smov %s1200_s26  ;;  %s1671_s26 = smov %s1287_s10 }
 0x203   : > { %s1672_s27 = smov %s1276_s30  ;;  %19 = sbr.rel (!%p17_p3) target bundleno = 3 (0x3), region = 84 }
 0x20a   :  { %952 = vsyncpa [#allocation3], 1 }
 0x20b   :  { %954 = vsyncpa [#allocation3 + $0x1], 1 }

</bundles_post_ra>
